<compile_context>
chip_gen: v7x
topology: tpu7x:2x2x1
jax: 0.10.0
libtpu: 0.0.40
codegen_flags: <defaults>
</compile_context>

<pallas_src>
import functools

import jax
import jax.numpy as jnp
from jax import lax
from jax.experimental import pallas as pl
from jax.experimental.pallas import tpu as pltpu

_LANE = 128  # TPU lane width; layer widths 100/10 are zero-padded to this


def _round_up(x, m):
    return (x + m - 1) // m * m


# ---------------------------------------------------------------------------
# Parameter packing (done once, wrapper side)
# ---------------------------------------------------------------------------
def _pad_lanes(a, width=_LANE):
    """Zero-pad the last dim of `a` up to `width`."""
    pad = width - a.shape[-1]
    return jnp.pad(a, [(0, 0)] * (a.ndim - 1) + [(0, pad)])


def pack_params(params, *, h_total):
    """Pack all weights/biases into one lane-dense (R, 128) f32 slab.

    Layout (Hr = round_up(H, 8), so every block starts sublane-aligned):
      rows [0,    Hr)      : W1 (H, 100) zero-padded to (Hr, 128)
      rows [Hr,   Hr+128)  : W2 (100, 10) zero-padded to (128, 128)
      rows [Hr+128, +8)    : misc: row0=b1, row1=b2, row2=w3 (as a row),
                             row3=b3 broadcast across lanes
    """
    H = h_total
    Hr = _round_up(H, 8)
    w1 = params["w1"]                       # (H, 100)
    b1 = params["b1"].reshape(-1)           # (100,)
    w2 = params["w2"]                       # (100, 10)
    b2 = params["b2"].reshape(-1)           # (10,)
    w3 = params["w3"].reshape(-1)           # (10,)
    b3 = params["b3"].reshape(-1)           # (1,)

    w1p = jnp.pad(_pad_lanes(w1), ((0, Hr - H), (0, 0)))                # (Hr, 128)
    w2p = _pad_lanes(jnp.pad(w2, ((0, _LANE - w2.shape[0]), (0, 0))))   # (128, 128)

    misc = jnp.zeros((8, _LANE), jnp.float32)
    misc = misc.at[0, : b1.shape[0]].set(b1)
    misc = misc.at[1, : b2.shape[0]].set(b2)
    misc = misc.at[2, : w3.shape[0]].set(w3)
    misc = misc.at[3, :].set(b3[0])

    return jnp.concatenate([w1p, w2p, misc], axis=0).astype(jnp.float32)


# ---------------------------------------------------------------------------
# Kernels
# ---------------------------------------------------------------------------
def _mlp_tail(h1_pre, wp_ref, Hr, o_ref):
    """+b1 -> ReLU -> Linear(128) -> ReLU -> lane-packed Linear(10,1) store."""
    w2 = wp_ref[pl.ds(Hr, _LANE), :]              # (128, 128)
    misc = wp_ref[pl.ds(Hr + _LANE, 8), :]        # (8, 128)
    b1, b2, w3r = misc[0:1], misc[1:2], misc[2:3]
    b3 = misc[3:4, 0:1]                           # (1, 1) scalar-ish

    h1 = jnp.maximum(h1_pre + b1, 0.0)                                   # (tb, 128)
    h2 = jnp.dot(h1, w2, preferred_element_type=jnp.float32) + b2
    h2 = jnp.maximum(h2, 0.0)                                            # (tb, 128)
    # Layer 3 on the MXU, producing the logits already lane-packed:
    #   (1, 128) @ (128, tb) -> (1, tb); output row = tb logits in lanes.
    packed = jnp.dot(w3r, h2.T, preferred_element_type=jnp.float32) + b3
    o_ref[...] = packed.astype(o_ref.dtype)                              # (1, tb)


def _disc_kernel_uni(x_ref, wp_ref, o_ref, *, H, Hr):
    x = x_ref[...]                                # (tb, H) = enc[-1]
    w1 = wp_ref[pl.ds(0, H), :]                   # (H, 128)
    h1 = jnp.dot(x, w1, preferred_element_type=jnp.float32)
    _mlp_tail(h1, wp_ref, Hr, o_ref)


def _disc_kernel_bidir_full(xl_ref, xf_ref, wp_ref, o_ref, *, H, Hr):
    """Full-H input blocks: concat folded into one VPU lane-select."""
    xl = xl_ref[...]                              # (tb, H) = enc[-1]
    xf = xf_ref[...]                              # (tb, H) = enc[0]
    lane = lax.broadcasted_iota(jnp.int32, xl.shape, 1)
    hidden = jnp.where(lane < (H // 2), xl, xf)   # = cat(xl[:, :H/2], xf[:, H/2:])
    w1 = wp_ref[pl.ds(0, H), :]                   # single un-masked K=H matmul
    h1 = jnp.dot(hidden, w1, preferred_element_type=jnp.float32)
    _mlp_tail(h1, wp_ref, Hr, o_ref)


def _disc_kernel_bidir_half(xl_ref, xf_ref, wp_ref, o_ref, *, H, Hr):
    """Half-width input blocks (H/2 % 128 == 0): split-K, un-masked W1 halves."""
    Hh = H // 2
    xl = xl_ref[...]                              # (tb, H/2) = enc[-1][:, :H/2]
    xf = xf_ref[...]                              # (tb, H/2) = enc[0][:, H/2:]
    w1a = wp_ref[pl.ds(0, Hh), :]
    w1b = wp_ref[pl.ds(Hh, Hh), :]
    h1 = jnp.dot(xl, w1a, preferred_element_type=jnp.float32)
    h1 = h1 + jnp.dot(xf, w1b, preferred_element_type=jnp.float32)
    _mlp_tail(h1, wp_ref, Hr, o_ref)


# ---------------------------------------------------------------------------
# Wrapper
# ---------------------------------------------------------------------------
def _choose_tb(B, per_row_bytes):
    """Budget-derived batch tile (multiple of 8)."""
    budget = 8 * 1024 * 1024            # input double-buffer budget; safe for
                                        # v5e's 16 MiB scoped default & v7x VMEM
    tb_max = max(8, min(4096, (budget // per_row_bytes) // 8 * 8))
    if B < 16:
        return min(tb_max, _round_up(B, 8))       # one (possibly padded) block
    # >= 2 grid steps so both v7x TensorCores get work (parallel grid axis).
    return min(tb_max, _round_up(pl.cdiv(B, 2), 8))


def discriminator_forward(encoder_outputs, packed_params, *, bidirectional):
    """Discriminator.forward.

    encoder_outputs: (S, B, H) float32, time-major (PyTorch RNN convention).
    packed_params:   output of pack_params(...).
    Returns (B, 1) float32 logits.
    """
    S, B, H = encoder_outputs.shape
    Hr = _round_up(H, 8)
    half_blocks = bidirectional and (H // 2) % _LANE == 0

    in_w = (H // 2) if half_blocks else H
    n_in = 2 if bidirectional else 1
    per_row_bytes = 2 * n_in * in_w * 4           # 2x for double buffering
    tb = _choose_tb(B, per_row_bytes)
    G = pl.cdiv(B, tb)                            # partial last block is fine

    # Weight slab: constant index_map -> fetched once, resident across steps.
    wp_spec = pl.BlockSpec(packed_params.shape, lambda i: (0, 0))
    # Lane-packed output: one row of tb logits per grid step.
    out_spec = pl.BlockSpec((None, 1, tb), lambda i: (i, 0, 0))
    out_shape = jax.ShapeDtypeStruct((G, 1, tb), jnp.float32)

    if bidirectional:
        if half_blocks:
            kernel = functools.partial(_disc_kernel_bidir_half, H=H, Hr=Hr)
            enc_last = pl.BlockSpec((None, tb, H // 2), lambda i: (S - 1, i, 0))
            enc_first = pl.BlockSpec((None, tb, H // 2), lambda i: (0, i, 1))
        else:
            kernel = functools.partial(_disc_kernel_bidir_full, H=H, Hr=Hr)
            enc_last = pl.BlockSpec((None, tb, H), lambda i: (S - 1, i, 0))
            enc_first = pl.BlockSpec((None, tb, H), lambda i: (0, i, 0))
        in_specs = [enc_last, enc_first, wp_spec]
        args = (encoder_outputs, encoder_outputs, packed_params)
    else:
        kernel = functools.partial(_disc_kernel_uni, H=H, Hr=Hr)
        in_specs = [pl.BlockSpec((None, tb, H), lambda i: (S - 1, i, 0)), wp_spec]
        args = (encoder_outputs, packed_params)

    out = pl.pallas_call(
        kernel,
        out_shape=out_shape,
        grid=(G,),
        in_specs=in_specs,
        out_specs=out_spec,
        compiler_params=pltpu.CompilerParams(
            dimension_semantics=("parallel",),
            vmem_limit_bytes=32 * 1024 * 1024),
    )(*args)
    # Lane-packed (G, 1, tb) -> (B, 1); rows >= B (padding) are discarded.
    return out.reshape(G * tb)[:B].reshape(B, 1)


# ---------------------------------------------------------------------------
# Init + pure-JAX reference
# ---------------------------------------------------------------------------
def init_params(key, h_total):
    """Deterministic synthetic parameters matching nn.Linear shapes.

    PyTorch stores Linear weight as (out, in); here weights are (in, out) so
    the kernel computes plain x @ W + b.
    """
    ks = jax.random.split(key, 6)
    s1 = 1.0 / jnp.sqrt(h_total)
    s2 = 1.0 / jnp.sqrt(100.0)
    s3 = 1.0 / jnp.sqrt(10.0)
    return {
        "w1": jax.random.uniform(ks[0], (h_total, 100), jnp.float32, -s1, s1),
        "b1": jax.random.uniform(ks[1], (100,), jnp.float32, -s1, s1),
        "w2": jax.random.uniform(ks[2], (100, 10), jnp.float32, -s2, s2),
        "b2": jax.random.uniform(ks[3], (10,), jnp.float32, -s2, s2),
        "w3": jax.random.uniform(ks[4], (10, 1), jnp.float32, -s3, s3),
        "b3": jax.random.uniform(ks[5], (1,), jnp.float32, -s3, s3),
    }


def _reference_forward(encoder_outputs, params, *, bidirectional):
    hp = jax.lax.Precision.HIGHEST
    h_total = encoder_outputs.shape[-1]
    if bidirectional:
        half = h_total // 2
        hidden = jnp.concatenate(
            (encoder_outputs[-1, :, :half], encoder_outputs[0, :, half:]),
            axis=-1)
    else:
        hidden = encoder_outputs[-1]
    h1 = jnp.maximum(jnp.dot(hidden, params["w1"], precision=hp) + params["b1"], 0.0)
    h2 = jnp.maximum(jnp.dot(h1, params["w2"], precision=hp) + params["b2"], 0.0)
    return jnp.dot(h2, params["w3"], precision=hp) + params["b3"]


def _run_case(key, *, S, B, hidden_size, bidirectional, tag):
    k_in, k_p = jax.random.split(key)
    h_total = 2 * hidden_size if bidirectional else hidden_size
    enc = jax.random.normal(k_in, (S, B, h_total), jnp.float32)
    params = init_params(k_p, h_total)
    packed = pack_params(params, h_total=h_total)

    out = discriminator_forward(enc, packed, bidirectional=bidirectional)
    out = jax.block_until_ready(out)
    ref = _reference_forward(enc, params, bidirectional=bidirectional)
    assert out.shape == (B, 1), (tag, out.shape)
    assert jnp.allclose(out, ref, atol=2e-5, rtol=2e-5), (tag, out, ref)


# ---------------------------------------------------------------------------
if __name__ == "__main__":
    keys = jax.random.split(jax.random.PRNGKey(0), 4)

    # 1) bidirectional, H=64 -> full-block lane-select path (single block).
    _run_case(keys[0], S=8, B=2, hidden_size=32, bidirectional=True,
              tag="bidir_small")
    # 2) unidirectional, H=32.
    _run_case(keys[1], S=8, B=2, hidden_size=32, bidirectional=False,
              tag="unidir_small")
    # 3) bidirectional, H=512 (H/2 % 128 == 0) -> half-width input blocks,
    #    2 grid steps (megacore-parallel batch axis).
    _run_case(keys[2], S=4, B=48, hidden_size=256, bidirectional=True,
              tag="bidir_halfblocks")
    # 4) bidirectional, awkward B=20 -> cdiv grid with a partial last block.
    _run_case(keys[3], S=8, B=20, hidden_size=32, bidirectional=True,
              tag="bidir_partial_batch")

    print("KERNEL_OK")
</pallas_src>

<mosaic_0001>
module attributes {stable_mosaic.version = 11 : i64} {
  func.func @_disc_kernel_bidir_full(%arg0: i32, %arg1: memref<1x8x64xf32, #tpu.memory_space<vmem>>, %arg2: memref<1x8x64xf32, #tpu.memory_space<vmem>>, %arg3: memref<200x128xf32, #tpu.memory_space<vmem>>, %arg4: memref<1x1x8xf32, #tpu.memory_space<vmem>>) attributes {dimension_semantics = [#tpu.dimension_semantics<parallel>], iteration_bounds = array<i64: 1>, scalar_prefetch = 0 : i64, scratch_operands = 0 : i64, tpu.core_type = #tpu.core_type<tc>, window_params = [{transform_indices = @transform_0, window_bounds = array<i64: 1, 8, 64>}, {transform_indices = @transform_1, window_bounds = array<i64: 1, 8, 64>}, {pipeline_mode = #tpu.pipeline_mode<synchronous>, transform_indices = @transform_2, window_bounds = array<i64: 200, 128>}, {transform_indices = @transform_3, window_bounds = array<i64: 1, 1, 8>}]} {
    %c0 = arith.constant 0 : index
    %c0_0 = arith.constant 0 : index
    %c0_1 = arith.constant 0 : index
    %0 = vector.load %arg1[%c0, %c0_0, %c0_1] : memref<1x8x64xf32, #tpu.memory_space<vmem>>, vector<1x8x64xf32>
    %1 = vector.shape_cast %0 : vector<1x8x64xf32> to vector<8x64xf32>
    %c0_2 = arith.constant 0 : index
    %c0_3 = arith.constant 0 : index
    %c0_4 = arith.constant 0 : index
    %2 = vector.load %arg2[%c0_2, %c0_3, %c0_4] : memref<1x8x64xf32, #tpu.memory_space<vmem>>, vector<1x8x64xf32>
    %3 = vector.shape_cast %2 : vector<1x8x64xf32> to vector<8x64xf32>
    %4 = tpu.iota {dimensions = array<i32: 1>} : vector<8x64xi32>
    %c32_i32 = arith.constant 32 : i32
    %5 = vector.broadcast %c32_i32 : i32 to vector<8x64xi32>
    %6 = arith.cmpi slt, %4, %5 : vector<8x64xi32>
    %7 = arith.select %6, %1, %3 : vector<8x64xi1>, vector<8x64xf32>
    %c0_5 = arith.constant 0 : index
    %c0_6 = arith.constant 0 : index
    %8 = vector.load %arg3[%c0_5, %c0_6] : memref<200x128xf32, #tpu.memory_space<vmem>>, vector<64x128xf32>
    %cst = arith.constant dense<0.000000e+00> : vector<8x128xf32>
    %9 = tpu.matmul %7, %8, %cst {dimension_numbers = #tpu.dot_dimension_numbers<[1], [0], [0], [1], [0, 0, 1, 1], [], []>} : vector<8x64xf32>, vector<64x128xf32>, vector<8x128xf32> -> vector<8x128xf32>
    %c64 = arith.constant 64 : index
    %c0_7 = arith.constant 0 : index
    %10 = vector.load %arg3[%c64, %c0_7] : memref<200x128xf32, #tpu.memory_space<vmem>>, vector<128x128xf32>
    %c192 = arith.constant 192 : index
    %c0_8 = arith.constant 0 : index
    %11 = vector.load %arg3[%c192, %c0_8] : memref<200x128xf32, #tpu.memory_space<vmem>>, vector<8x128xf32>
    %12 = vector.extract_strided_slice %11 {offsets = [0, 0], sizes = [1, 128], strides = [1, 1]} : vector<8x128xf32> to vector<1x128xf32>
    %13 = vector.extract_strided_slice %11 {offsets = [1, 0], sizes = [1, 128], strides = [1, 1]} : vector<8x128xf32> to vector<1x128xf32>
    %14 = vector.extract_strided_slice %11 {offsets = [2, 0], sizes = [1, 128], strides = [1, 1]} : vector<8x128xf32> to vector<1x128xf32>
    %15 = vector.extract_strided_slice %11 {offsets = [3, 0], sizes = [1, 1], strides = [1, 1]} : vector<8x128xf32> to vector<1x1xf32>
    %16 = vector.broadcast %12 : vector<1x128xf32> to vector<8x128xf32>
    %17 = arith.addf %9, %16 : vector<8x128xf32>
    %cst_9 = arith.constant 0.000000e+00 : f32
    %18 = vector.broadcast %cst_9 : f32 to vector<8x128xf32>
    %19 = arith.maximumf %17, %18 : vector<8x128xf32>
    %cst_10 = arith.constant dense<0.000000e+00> : vector<8x128xf32>
    %20 = tpu.matmul %19, %10, %cst_10 {dimension_numbers = #tpu.dot_dimension_numbers<[1], [0], [0], [1], [0, 0, 1, 1], [], []>} : vector<8x128xf32>, vector<128x128xf32>, vector<8x128xf32> -> vector<8x128xf32>
    %21 = vector.broadcast %13 : vector<1x128xf32> to vector<8x128xf32>
    %22 = arith.addf %20, %21 : vector<8x128xf32>
    %cst_11 = arith.constant 0.000000e+00 : f32
    %23 = vector.broadcast %cst_11 : f32 to vector<8x128xf32>
    %24 = arith.maximumf %22, %23 : vector<8x128xf32>
    %25 = tpu.transpose %24, [1, 0] : vector<8x128xf32> -> vector<128x8xf32>
    %cst_12 = arith.constant dense<0.000000e+00> : vector<1x8xf32>
    %26 = tpu.matmul %14, %25, %cst_12 {dimension_numbers = #tpu.dot_dimension_numbers<[1], [0], [0], [1], [0, 0, 1, 1], [], []>} : vector<1x128xf32>, vector<128x8xf32>, vector<1x8xf32> -> vector<1x8xf32>
    %27 = vector.broadcast %15 : vector<1x1xf32> to vector<1x8xf32>
    %28 = arith.addf %26, %27 : vector<1x8xf32>
    %c0_13 = arith.constant 0 : index
    %c0_14 = arith.constant 0 : index
    %c0_15 = arith.constant 0 : index
    %29 = vector.load %arg4[%c0_13, %c0_14, %c0_15] : memref<1x1x8xf32, #tpu.memory_space<vmem>>, vector<1x1x8xf32>
    %30 = vector.shape_cast %29 : vector<1x1x8xf32> to vector<1x8xf32>
    %31 = vector.shape_cast %28 : vector<1x8xf32> to vector<1x1x8xf32>
    tpu.vector_store %arg4[%c0_13, %c0_14, %c0_15], %31 {strides = array<i32>} : memref<1x1x8xf32, #tpu.memory_space<vmem>>, vector<1x1x8xf32>,
    return
  }
  func.func @transform_0(%arg0: i32) -> (i32, i32, i32) {
    %c7_i32 = arith.constant 7 : i32
    %c0_i32 = arith.constant 0 : i32
    %c0_i32_0 = arith.constant 0 : i32
    return %c7_i32, %arg0, %c0_i32 : i32, i32, i32
  }
  func.func @transform_1(%arg0: i32) -> (i32, i32, i32) {
    %c0_i32 = arith.constant 0 : i32
    %c0_i32_0 = arith.constant 0 : i32
    %c0_i32_1 = arith.constant 0 : i32
    return %c0_i32, %arg0, %c0_i32_0 : i32, i32, i32
  }
  func.func @transform_2(%arg0: i32) -> (i32, i32) {
    %c0_i32 = arith.constant 0 : i32
    %c0_i32_0 = arith.constant 0 : i32
    %c0_i32_1 = arith.constant 0 : i32
    return %c0_i32, %c0_i32_0 : i32, i32
  }
  func.func @transform_3(%arg0: i32) -> (i32, i32, i32) {
    %c0_i32 = arith.constant 0 : i32
    %c0_i32_0 = arith.constant 0 : i32
    %c0_i32_1 = arith.constant 0 : i32
    return %arg0, %c0_i32, %c0_i32_0 : i32, i32, i32
  }
}

</mosaic_0001>

<bundles_post_ra>
// kernel: tpu_custom_call.1
= control target key start
LH: loop header
LB: loop body
LE: loop exit
PB: predicated region body
PF: predicated region fallthrough
CT: control target
= control target key end

     0   :  { %8 = vsyncpa [#allocation3], 0  ;;  %s674_s0 = inlined_call_operand.hbm [shape: f32[8,2,64], index: 0, kind: input, shape index: {}]   ;;  %s675_s1 = inlined_call_operand.hbm [shape: f32[8,2,64], index: 1, kind: input, shape index: {}]   ;;  %s676_s2 = inlined_call_operand.hbm [shape: f32[200,128], index: 2, kind: input, shape index: {}]   ;;  %s677_s3 = inlined_call_operand.hbm [shape: f32[1,1,8], index: 3, kind: output, shape index: {}]  }
   0x1   :  { %9 = vsyncpa [#allocation6], 0 }
   0x2   :  { %10 = vsyncpa [#allocation4], 0 }
   0x3   :  { %15 = vsyncadd [#allocation3], 96  ;;  %s16_s14 = scalar_lea.hbm %s674_s0, 224  ;;  %s572_s15 = smov [#allocation2]  }
   0x4   :  { %s17_s16 = sshll.u32 %s572_s15, 4  ;;  %s499_s19 = scalar_lea.hbm %s674_s0, 256  ;;  %s18_s16 = int_to_ptr.vmem [resolvable:$true] %s17_s16 }
   0x5   :  { %p476_p0 = scmp.ne.s32.totalorder %s16_s14, %s499_s19  ;;  %p478_p1 = scmp.lt.u32.totalorder %s16_s14, %s674_s0 }
   0x6   :  { %p479_p2 = scmp.lt.u32.totalorder %s499_s19, %s499_s19  ;;  %p481_p4 = scmp.lt.u32.totalorder %s499_s19, %s16_s14 }
   0x8   :  { %p480_p3 = por %p479_p2, %p478_p1 }
   0xa   :  { %p482_p5 = por %p481_p4, %p480_p3 }
   0xc   :  { %p483_p6 = pnand %p482_p5, %p476_p0 }
   0xe   :  { %486 = shalt.err (!%p483_p6)
}
   0xf   :  { %s487_s22 = scalar_lea.vmem %s18_s16, 32  ;;  %s491_s23 = scalar_lea.vmem %s18_s16, 128 }
  0x10   :  { %p488_p7 = scmp.ne.s32.totalorder %s18_s16, %s487_s22  ;;  %p492_p8 = scmp.lt.s32.totalorder %s18_s16, %s18_s16 }
  0x11   :  { %p493_p9 = scmp.lt.s32.totalorder %s491_s23, %s487_s22 }
  0x13   :  { %p494_p10 = por %p493_p9, %p492_p8 }
  0x15   :  { %p495_p11 = pnand %p494_p10, %p488_p7 }
  0x17   :  { %498 = shalt.err (!%p495_p11)
}
  0x18   :  { %s573_s24 = smov 32   ;;  %s574_s25 = smov 2  }
  0x19   :  { %23 = dma.hbm_to_vmem [thread:$0]  %s16_s14, 32, %s18_s16, [#allocation3], %s573_s24, %s573_s24, %s574_s25  }
  0x1a   :  { %28 = vsyncadd [#allocation6], 96  ;;  %s575_s26 = smov [#allocation5]   ;;  %s576_s27 = smov [#allocation7]  }
  0x1b   :  { %s29_s0 = sshll.u32 %s575_s26, 4  ;;  %s41_s28 = sshll.u32 %s576_s27, 4  ;;  %s30_s0 = int_to_ptr.vmem [resolvable:$true] %s29_s0  ;;  %s613_s28 = int_to_ptr.vmem [resolvable:$true] %s41_s28 }
  0x1c   :  { %s500_s4 = scalar_lea.hbm %s675_s1, 32  ;;  %s502_s9 = scalar_lea.hbm %s675_s1, 256 }
  0x1d   :  { %p501_p12 = scmp.ne.s32.totalorder %s675_s1, %s500_s4  ;;  %p503_p13 = scmp.lt.u32.totalorder %s502_s9, %s500_s4 }
  0x1e   :  { %p504_p0 = scmp.lt.u32.totalorder %s500_s4, %s675_s1 }
  0x20   :  { %p505_p1 = por %p504_p0, %p503_p13 }
  0x22   :  { %p506_p2 = pnand %p505_p1, %p501_p12 }
  0x24   :  { %509 = shalt.err (!%p506_p2)
}
  0x25   :  { %s510_s12 = scalar_lea.vmem %s30_s0, 32  ;;  %s514_s13 = scalar_lea.vmem %s30_s0, 128 }
  0x26   :  { %p511_p3 = scmp.ne.s32.totalorder %s30_s0, %s510_s12  ;;  %p515_p4 = scmp.lt.s32.totalorder %s30_s0, %s30_s0 }
  0x27   :  { %p516_p5 = scmp.lt.s32.totalorder %s514_s13, %s510_s12 }
  0x29   :  { %p517_p6 = por %p516_p5, %p515_p4 }
  0x2b   :  { %p518_p7 = pnand %p517_p6, %p511_p3 }
  0x2d   :  { %521 = shalt.err (!%p518_p7)
}
  0x2e   :  { %35 = dma.hbm_to_vmem [thread:$0]  %s675_s1, 32, %s30_s0, [#allocation6], %s573_s24, %s573_s24, %s574_s25  }
  0x2f   :  { %s522_s18 = scalar_lea.hbm %s676_s2, 3200 }
  0x30   :  { %p523_p8 = scmp.ne.s32.totalorder %s676_s2, %s522_s18  ;;  %p526_p9 = scmp.lt.u32.totalorder %s522_s18, %s676_s2 }
  0x32   :  { %p528_p10 = pnand %p526_p9, %p523_p8 }
  0x34   :  { %531 = shalt.err (!%p528_p10)
}
  0x35   :  { %s532_s23 = scalar_lea.vmem %s613_s28, 3200  ;;  %p537_p12 = scmp.lt.s32.totalorder %s613_s28, %s613_s28 }
  0x36   :  { %p533_p11 = scmp.ne.s32.totalorder %s613_s28, %s532_s23  ;;  %p538_p13 = scmp.lt.s32.totalorder %s532_s23, %s532_s23 }
  0x38   :  { %p539_p0 = por %p538_p13, %p537_p12 }
  0x3a   :  { %p540_p1 = pnand %p539_p0, %p533_p11 }
  0x3c   :  { %543 = shalt.err (!%p540_p1)
}
  0x3d   :  { %s577_s1 = smov 128   ;;  %s578_s24 = smov 8  }
  0x3e   :  { %47 = dma.hbm_to_vmem [thread:$0]  %s676_s2, 3200, %s613_s28, [#allocation6], %s577_s1, %s577_s1, %s578_s24  }
  0x3f   :  { %566 = dma.done.wait [#allocation3], 128  }
  0x40   :  { %567 = vsyncadd [#allocation3], 4294967168 }
  0x41   :  { %568 = dma.done.wait [#allocation6], 3328  }
  0x42   :  { %569 = vsyncadd [#allocation6], 4294963968  ;;  %v579_v0 = vmov 0.0|0.0   ;;  %vm580_vm0 = vmmov 0   ;;  %v581_v1 = vmov 0.0   ;;  %v63_v2 = vld [vmem:[#allocation7] sm:$0xff]  ;;  %v59_v12 = vlaneseq }
  0x43   :  { %426 = vmatprep.subr.bf16.mxu0 %v579_v0  ;;  %383 = vmatprep.mubr.msk.f32.mxu0 %vm580_vm0, %v581_v1  ;;  %v64_v3 = vld [vmem:[#allocation7 + $0x8] sm:$0xff]  ;;  %v65_v4 = vld [vmem:[#allocation7 + $0x10] sm:$0xff]  ;;  %v66_v6 = vld [vmem:[#allocation7 + $0x18] sm:$0xff]  ;;  %vm92_vm2 = vcmask 523264   ;;  %v582_v51 = vmov 0   ;;  %s583_s2 = smov [#allocation8]  }
  0x44   :  { %438 = vmatprep.subr.bf16.mxu1 %v579_v0  ;;  %418 = vmatprep.mubr.msk.f32.mxu1 %vm580_vm0, %v581_v1  ;;  %v427_v5 = vpack.c.bf16 %v64_v3, %v63_v2  ;;  %v430_v7 = vpack.c.bf16 %v66_v6, %v65_v4  ;;  %v67_v8 = vld [vmem:[#allocation7 + $0x20] sm:$0xff]  ;;  %v72_v10 = vld [vmem:[#allocation7 + $0x48] sm:$0xff]  ;;  %v73_v14 = vld [vmem:[#allocation7 + $0x50] sm:$0xff]  ;;  %v60_v22 = vand.u32 127, %v59_v12  ;;  %v89_v43 = vshrl.u32 %v59_v12, 7  ;;  %s328_s0 = sshll.u32 %s583_s2, 4  ;;  %s329_s0 = int_to_ptr.vmem [resolvable:$true] %s328_s0 }
  0x45   :  { %v71_v9 = vld [vmem:[#allocation7 + $0x40] sm:$0xff]  ;;  %v68_v11 = vld [vmem:[#allocation7 + $0x28] sm:$0xff]  ;;  %v74_v15 = vld [vmem:[#allocation7 + $0x58] sm:$0xff]  ;;  %474 = vset.pattern.permute.xlu0 %v582_v51  ;;  %vm320_vm3 = vcmask 57344   ;;  %s544_s27 = scalar_lea.vmem %s329_s0, 16  ;;  %s548_s28 = scalar_lea.vmem %s329_s0, 32 }
  0x46   :  { %428 = vmatpush3.bf16.msra.mxu0 %v427_v5  ;;  %v439_v13 = vpack.c.bf16 %v72_v10, %v71_v9  ;;  %v442_v16 = vpack.c.bf16 %v74_v15, %v73_v14  ;;  %v433_v17 = vpack.c.bf16 %v68_v11, %v67_v8  ;;  %v75_v18 = vld [vmem:[#allocation7 + $0x60] sm:$0xff]  ;;  %v76_v19 = vld [vmem:[#allocation7 + $0x68] sm:$0xff]  ;;  %v69_v20 = vld [vmem:[#allocation7 + $0x30] sm:$0xff]  ;;  %vm61_vm1 = vcmp.lt.s32.totalorder %v60_v22, 32  ;;  %p545_p2 = scmp.ne.s32.totalorder %s329_s0, %s544_s27  ;;  %p549_p3 = scmp.lt.s32.totalorder %s329_s0, %s329_s0 }
  0x47   :  { %429 = vmatprep.subr.bf16.mxu0 %v579_v0  ;;  %v70_v21 = vld [vmem:[#allocation7 + $0x38] sm:$0xff]  ;;  %v445_v23 = vpack.c.bf16 %v76_v19, %v75_v18  ;;  %v77_v25 = vld [vmem:[#allocation7 + $0x70] sm:$0xff]  ;;  %v79_v31 = vld [vmem:[#allocation7 + $0x80] sm:$0xff]  ;;  %v90_v44 = vsub.s32 0, %v89_v43  ;;  %v169_v52 = vsub.s32 1, %v89_v43  ;;  %p550_p4 = scmp.lt.s32.totalorder %s548_s28, %s544_s27 }
  0x48   :  { %440 = vmatpush3.bf16.msra.mxu1 %v439_v13  ;;  %v436_v24 = vpack.c.bf16 %v70_v21, %v69_v20  ;;  %v78_v26 = vld [vmem:[#allocation7 + $0x78] sm:$0xff]  ;;  %v57_v27 = vld [vmem:[#allocation2] sm:$0xff]  ;;  %v80_v32 = vld [vmem:[#allocation7 + $0x88] sm:$0xff] }
  0x49   :  { %441 = vmatprep.subr.bf16.mxu1 %v579_v0  ;;  %v58_v28 = vld [vmem:[#allocation5] sm:$0xff]  ;;  %v448_v29 = vpack.c.bf16 %v78_v26, %v77_v25  ;;  %v451_v33 = vpack.c.bf16 %v80_v32, %v79_v31  ;;  %v81_v34 = vld [vmem:[#allocation7 + $0x90] sm:$0xff]  ;;  %v83_v37 = vld [vmem:[#allocation7 + $0xa0] sm:$0xff]  ;;  %p551_p5 = por %p550_p4, %p549_p3 }
  0x4a   :  { %431 = vmatpush3.bf16.msra.mxu0 %v430_v7  ;;  %v62_v30 = vsel %vm61_vm1, %v57_v27, %v58_v28  ;;  %v82_v35 = vld [vmem:[#allocation7 + $0x98] sm:$0xff]  ;;  %v84_v38 = vld [vmem:[#allocation7 + $0xa8] sm:$0xff]  ;;  %v85_v40 = vld [vmem:[#allocation7 + $0xb0] sm:$0xff] }
  0x4b   :  { %432 = vmatprep.subr.bf16.mxu0 %v579_v0  ;;  %v454_v36 = vpack.c.bf16 %v82_v35, %v81_v34  ;;  %v457_v39 = vpack.c.bf16 %v84_v38, %v83_v37  ;;  %v86_v41 = vld [vmem:[#allocation7 + $0xb8] sm:$0xff]  ;;  %v87_v45 = vld [vmem:[#allocation7 + $0xc0] sm:$0xff]  ;;  %p552_p6 = pnand %p551_p5, %p545_p2 }
  0x4c   :  { %443 = vmatpush3.bf16.msra.mxu1 %v442_v16  ;;  %v460_v42 = vpack.c.bf16 %v86_v41, %v85_v40  ;;  %v91_v46 = vrot.slane %v87_v45, %v90_v44  ;;  %244 = vperm.xlu0 %474, %v87_v45   ;;  %v170_v53 = vrot.slane %v87_v45, %v169_v52  ;;  %v246_v58 = vrot.slane %v87_v45, 2 }
  0x4d   :  { %444 = vmatprep.subr.bf16.mxu1 %v579_v0 }
  0x4e   :  { %434 = vmatpush3.bf16.msra.mxu0 %v433_v17 }
  0x4f   :  { %435 = vmatprep.subr.bf16.mxu0 %v579_v0 }
  0x50   :  { %446 = vmatpush3.bf16.msra.mxu1 %v445_v23 }
  0x51   :  { %447 = vmatprep.subr.bf16.mxu1 %v579_v0 }
  0x52   :  { %437 = vmatpush3.bf16.msra.mxu0 %v436_v24 }
  0x53   :  { %421 = vmatprep.subr.mxu0 %v581_v1 }
  0x54   :  { %449 = vmatpush3.bf16.msra.mxu1 %v448_v29 }
  0x55   :  { %384 = vmatmul.mubr.msk.f32.vlgmr.msra.gmra.mrb[0].mxu0 %vm92_vm2, %v62_v30  ;;  %450 = vmatprep.subr.bf16.mxu1 %v579_v0 }
  0x56   :  { %423 = vmatprep.mubr.msk.f32.mxu0 %vm580_vm0, %v581_v1 }
  0x58   :  { %452 = vmatpush3.bf16.msra.mxu1 %v451_v33 }
  0x59   :  { %453 = vmatprep.subr.bf16.mxu1 %v579_v0 }
  0x5c   :  { %455 = vmatpush3.bf16.msra.mxu1 %v454_v36 }
  0x5d   :  { %456 = vmatprep.subr.bf16.mxu1 %v579_v0 }
  0x60   :  { %458 = vmatpush3.bf16.msra.mxu1 %v457_v39 }
  0x61   :  { %459 = vmatprep.subr.bf16.mxu1 %v579_v0 }
  0x64   :  { %461 = vmatpush3.bf16.msra.mxu1 %v460_v42 }
  0xcb   :  { %v245_v59 = vpop.permute.xlu0 %244 }
  0xcc   :  { %v248_v60 = vrot.slane %v245_v59, 3 }
 0x128   :  { %v162_v47 = vpop.f32.mrb[0].mxu0 }
 0x129   :  { %v163_v48 = vadd.f32 %v162_v47, %v91_v46  ;;  %v385_v49 = vpop.f32.mrb[1].mxu0 }
 0x12b   :  { %v166_v50 = vmax.f32 %v163_v48, 0.0 }
 0x12d   :  { %419 = vmatmul.mubr.f32.vlgmr.msra.gmra.mrb[0].mxu1 %v166_v50 }
 0x200   :  { %v237_v54 = vpop.f32.mrb[0].mxu1 }
 0x201   :  { %v238_v55 = vadd.f32 %v237_v54, %v170_v53  ;;  %v420_v56 = vpop.f32.mrb[1].mxu1 }
 0x203   :  { %v241_v57 = vmax.f32 %v238_v55, 0.0 }
 0x205   :  { %422 = vmatpush3.xpose.msra.mxu0 %v241_v57 }
 0x208   :  { %424 = vmatmul.mubr.f32.vlgmr.msra.gmra.mrb[2].mxu0 %v246_v58 }
 0x2db   :  { %v316_v61 = vpop.f32.mrb[2].mxu0 }
 0x2dc   :  { %v317_v62 = vadd.f32 %v316_v61, %v248_v60  ;;  %v425_v63 = vpop.f32.mrb[3].mxu0 }
 0x2de   :  { %321 = vst.msk [vmem:[#allocation8] sm:$0x1] %vm320_vm3, %v317_v62 }
 0x2df   :  { %555 = shalt.err (!%p552_p6)
}
 0x2e0   :  { %s556_s4 = scalar_lea.hbm %s677_s3, 16 }
 0x2e1   :  { %p557_p7 = scmp.ne.s32.totalorder %s677_s3, %s556_s4  ;;  %p560_p8 = scmp.lt.u32.totalorder %s556_s4, %s677_s3 }
 0x2e3   :  { %p562_p9 = pnand %p560_p8, %p557_p7 }
 0x2e5   :  { %565 = shalt.err (!%p562_p9)
}
 0x2e6   :  { %331 = dma.vmem_to_hbm [thread:$0]  %s329_s0, 16, %s677_s3, [#allocation4]  }
 0x2e7   :  { %570 = dma.done.wait [#allocation4], 16  }
 0x2e8   :  { %571 = vsyncadd [#allocation4], 4294967280 }
 0x2e9   :  { %335 = vsyncpa [#allocation3], 1 }
 0x2ea   :  { %336 = vsyncpa [#allocation6], 1 }
 0x2eb   :  { %337 = vsyncpa [#allocation4], 1 }

</bundles_post_ra>
